<compile_context>
chip_gen: v7x
topology: tpu7x:2x2x1
jax: 0.10.0
libtpu: 0.0.40
codegen_flags: <defaults>
</compile_context>

<pallas_src>
import functools

import jax
import jax.numpy as jnp
from jax import lax
from jax.experimental import pallas as pl
from jax.experimental.pallas import tpu as pltpu

_LANES = 128
_MAX_TILE_ROWS = 2048          # <= 1 MiB (f32) per input block per grid step
_SMALL_INPUT_BYTES = 1 << 20   # below this (both tensors combined) use plain XLA
_L1_WEIGHT = 0.1


def _round_up(x: int, m: int) -> int:
    return (x + m - 1) // m * m


def _cdiv(a: int, b: int) -> int:
    return -(-a // b)


def _sublane_multiple(dtype) -> int:
    """Minimum sublane tile for a dtype: 8 for f32, 16 for bf16, 32 for int8/fp8."""
    itemsize = jnp.dtype(dtype).itemsize
    return max(8, 32 // max(itemsize, 1))


def _detect_num_tensorcores() -> int:
    """2 on v7x (2 TCs/chip), else 1 (v5e/v6e). Detection failure -> 1 (safe)."""
    try:
        kind = jax.devices()[0].device_kind.lower().replace(" ", "")
    except Exception:
        return 1
    if "v7" in kind or "7x" in kind:
        return 2
    return 1


def _fold_tile(p_ref, t_ref, *, tile_rows, slab_rows, row0, valid_rows):
    """Per-lane partial sums of d^2 + 0.1*|d| over one (tile_rows, 128) tile.

    Reads the refs one packed slab (slab_rows x 128) at a time and accumulates
    into a register-resident carry, so no (tile_rows, 128) temporary ever hits
    VMEM.  If `row0` is not None, rows with global id >= valid_rows are zeroed
    BEFORE squaring (handles ragged last tiles, clamped duplicate tiles and the
    stale region of DMA-clipped edge blocks).
    """
    masked = row0 is not None
    n_slabs = tile_rows // slab_rows
    w = jnp.float32(_L1_WEIGHT)

    def slab_update(s, acc):
        off = s * slab_rows
        if not isinstance(off, int):
            off = pl.multiple_of(off, slab_rows)
        d = (p_ref[pl.ds(off, slab_rows), :].astype(jnp.float32)
             - t_ref[pl.ds(off, slab_rows), :].astype(jnp.float32))
        if masked:
            rid = row0 + off + lax.broadcasted_iota(
                jnp.int32, (slab_rows, _LANES), 0)
            d = jnp.where(rid < valid_rows, d, 0.0)   # mask BEFORE square/abs
        return acc + (d * d + w * jnp.abs(d))

    acc0 = jnp.zeros((slab_rows, _LANES), jnp.float32)
    if n_slabs == 1:
        return slab_update(0, acc0)
    return lax.fori_loop(0, n_slabs, slab_update, acc0,
                         unroll=min(8, n_slabs))


def _loss_kernel(p_ref, t_ref, out_ref, acc_ref, *, tile_rows, tiles_per_part,
                 valid_rows, needs_mask, slab_rows):
    """Accumulate sum(d^2 + 0.1*|d|) per grid part; one SMEM scalar at the end.

    p_ref, t_ref : (tile_rows, 128) VMEM tiles (native dtype)
    out_ref      : (1, 1) SMEM scalar output block (one per part)
    acc_ref      : (slab_rows, 128) f32 VMEM accumulator (persists across steps)
    """
    c = pl.program_id(0)   # part (TensorCore on v7x; trivial axis otherwise)
    i = pl.program_id(1)   # tile within part (reduction axis)

    @pl.when(i == 0)
    def _init():
        acc_ref[...] = jnp.zeros_like(acc_ref)

    if needs_mask:
        # Virtual (unclamped) global start row of this tile.  Clamped duplicate
        # tiles get row0 >= valid_rows and therefore contribute exactly zero.
        row0 = (c * tiles_per_part + i) * tile_rows
        tile_fully_valid = row0 + tile_rows <= valid_rows

        @pl.when(tile_fully_valid)
        def _full():
            acc_ref[...] += _fold_tile(p_ref, t_ref, tile_rows=tile_rows,
                                       slab_rows=slab_rows, row0=None,
                                       valid_rows=valid_rows)

        @pl.when(jnp.logical_not(tile_fully_valid))
        def _ragged():
            acc_ref[...] += _fold_tile(p_ref, t_ref, tile_rows=tile_rows,
                                       slab_rows=slab_rows, row0=row0,
                                       valid_rows=valid_rows)
    else:
        acc_ref[...] += _fold_tile(p_ref, t_ref, tile_rows=tile_rows,
                                   slab_rows=slab_rows, row0=None,
                                   valid_rows=valid_rows)

    # Single cross-lane reduce + SMEM scalar store, last step only.
    @pl.when(i == pl.num_programs(1) - 1)
    def _finalize():
        out_ref[0, 0] = jnp.sum(acc_ref[...])


def _pallas_weighted_sum(p2, t2):
    """sum(d^2 + 0.1*|d|) over a (rows, 128) pair of arrays, as an f32 scalar."""
    rows = p2.shape[0]
    sub = max(_sublane_multiple(p2.dtype), _sublane_multiple(t2.dtype))

    ncores = _detect_num_tensorcores()
    # Largest tile (<= _MAX_TILE_ROWS) that still gives every core its own tile.
    tile_rows = min(_MAX_TILE_ROWS, _round_up(_cdiv(rows, ncores), sub))
    n_tiles = _cdiv(rows, tile_rows)
    nparts = min(ncores, n_tiles)
    tiles_per_part = _cdiv(n_tiles, nparts)
    # Masking needed if the last real tile is row-ragged (incl. tile_rows > rows,
    # where the clipped DMA leaves stale data), or if some (part, step) pairs map
    # past the last tile (clamped -> fully masked duplicates).
    needs_mask = (rows % tile_rows != 0) or (nparts * tiles_per_part != n_tiles)

    def in_index_map(c, i):
        t_idx = c * tiles_per_part + i
        if needs_mask:
            t_idx = jnp.minimum(t_idx, n_tiles - 1)   # never DMA past the array
        return (t_idx, 0)

    # Deeper input buffering only pays when there are enough grid steps to hide
    # DMA issue latency; at 1-2 steps the default double buffer is already fine.
    in_spec_kwargs = {}
    if tiles_per_part >= 4:
        in_spec_kwargs["pipeline_mode"] = pl.Buffered(3)

    def make_in_spec():
        return pl.BlockSpec((tile_rows, _LANES), in_index_map, **in_spec_kwargs)

    kernel = functools.partial(
        _loss_kernel,
        tile_rows=tile_rows,
        tiles_per_part=tiles_per_part,
        valid_rows=rows,
        needs_mask=needs_mask,
        slab_rows=sub,
    )

    if nparts > 1:
        # Detected multi-TensorCore chip (v7x): actually shard the leading axis
        # across the cores (plain "parallel" may not change codegen).
        dim_sem = (pltpu.CORE_PARALLEL, pltpu.ARBITRARY)
    else:
        dim_sem = (pltpu.ARBITRARY, pltpu.ARBITRARY)

    n_elems = rows * _LANES
    bytes_accessed = n_elems * (p2.dtype.itemsize + t2.dtype.itemsize)

    parts = pl.pallas_call(
        kernel,
        out_shape=jax.ShapeDtypeStruct((nparts, 1), jnp.float32),
        grid_spec=pltpu.PrefetchScalarGridSpec(
            num_scalar_prefetch=0,
            grid=(nparts, tiles_per_part),
            in_specs=[make_in_spec(), make_in_spec()],
            out_specs=pl.BlockSpec((1, 1), lambda c, i: (c, 0),
                                   memory_space=pltpu.SMEM),
            scratch_shapes=[pltpu.VMEM((sub, _LANES), jnp.float32)],
        ),
        compiler_params=pltpu.CompilerParams(dimension_semantics=dim_sem),
        cost_estimate=pl.CostEstimate(
            flops=6 * n_elems,
            transcendentals=0,
            bytes_accessed=bytes_accessed),
    )(p2, t2)

    return jnp.sum(parts)


def _xla_weighted_sum(p, t):
    d = p.astype(jnp.float32) - t.astype(jnp.float32)
    return jnp.sum(d * d) + jnp.float32(_L1_WEIGHT) * jnp.sum(jnp.abs(d))


def head_detection_loss(predictions, targets, *, force_pallas=False):
    """JAX/Pallas equivalent of HeadDetectionLoss.forward: mse + 0.1 * l1."""
    assert predictions.shape == targets.shape
    n = predictions.size

    p = predictions.reshape(-1)
    t = targets.reshape(-1)

    total_bytes = n * (jnp.dtype(predictions.dtype).itemsize
                       + jnp.dtype(targets.dtype).itemsize)
    aligned = (n // _LANES) * _LANES

    if aligned == 0 or (not force_pallas and total_bytes < _SMALL_INPUT_BYTES):
        # Tiny inputs: pallas_call launch / pipeline-prologue cost dominates; a
        # fused XLA reduction is as fast and avoids all reshape plumbing.
        weighted_sum = _xla_weighted_sum(p, t)
    else:
        if aligned == n:
            p_main, t_main = p, t
        else:
            p_main, t_main = p[:aligned], t[:aligned]
        weighted_sum = _pallas_weighted_sum(
            p_main.reshape(aligned // _LANES, _LANES),
            t_main.reshape(aligned // _LANES, _LANES))
        if aligned != n:
            # <128-element tail folded in with plain XLA (no jnp.pad of inputs).
            weighted_sum = weighted_sum + _xla_weighted_sum(p[aligned:],
                                                            t[aligned:])

    return weighted_sum * jnp.float32(1.0 / n)


def _reference(predictions, targets):
    d = predictions.astype(jnp.float32) - targets.astype(jnp.float32)
    return jnp.mean(d * d) + 0.1 * jnp.mean(jnp.abs(d))


if __name__ == "__main__":
    loss_auto = jax.jit(head_detection_loss)
    loss_pallas = jax.jit(functools.partial(head_detection_loss,
                                            force_pallas=True))

    # Small NCHW detection heatmaps (the module's typical usage).  Forced through
    # the Pallas path to exercise the kernel; auto dispatch uses plain XLA here.
    k1, k2 = jax.random.split(jax.random.PRNGKey(0))
    predictions = jax.random.normal(k1, (2, 4, 16, 16), dtype=jnp.float32)
    targets = jax.random.normal(k2, (2, 4, 16, 16), dtype=jnp.float32)
    ref = _reference(predictions, targets)
    loss = jax.block_until_ready(loss_pallas(predictions, targets))
    assert jnp.allclose(loss, ref, rtol=1e-5, atol=1e-6), (loss, ref)
    loss_small_auto = jax.block_until_ready(loss_auto(predictions, targets))
    assert jnp.allclose(loss_small_auto, ref, rtol=1e-5, atol=1e-6)

    # Lane-unaligned element count: kernel on the 128-aligned prefix + XLA tail.
    k5, k6 = jax.random.split(jax.random.PRNGKey(2))
    p_odd = jax.random.normal(k5, (2, 4, 11, 13), dtype=jnp.float32)
    t_odd = jax.random.normal(k6, (2, 4, 11, 13), dtype=jnp.float32)
    loss_odd = jax.block_until_ready(loss_pallas(p_odd, t_odd))
    ref_odd = _reference(p_odd, t_odd)
    assert jnp.allclose(loss_odd, ref_odd, rtol=1e-5, atol=1e-6), (loss_odd, ref_odd)

    # Larger, exactly tiled: auto dispatch takes the Pallas path.
    k3, k4 = jax.random.split(jax.random.PRNGKey(1))
    p_big = jax.random.normal(k3, (2, 8, 128, 128), dtype=jnp.float32)
    t_big = jax.random.normal(k4, (2, 8, 128, 128), dtype=jnp.float32)
    loss_big = jax.block_until_ready(loss_auto(p_big, t_big))
    ref_big = _reference(p_big, t_big)
    assert jnp.allclose(loss_big, ref_big, rtol=1e-5, atol=1e-6), (loss_big, ref_big)

    # Larger, row-ragged vs the tile size: exercises the pl.when-gated masked
    # tile path and multi-tile accumulation.
    k7, k8 = jax.random.split(jax.random.PRNGKey(3))
    p_rag = jax.random.normal(k7, (5, 8, 64, 128), dtype=jnp.float32)
    t_rag = jax.random.normal(k8, (5, 8, 64, 128), dtype=jnp.float32)
    loss_rag = jax.block_until_ready(loss_auto(p_rag, t_rag))
    ref_rag = _reference(p_rag, t_rag)
    assert jnp.allclose(loss_rag, ref_rag, rtol=1e-5, atol=1e-6), (loss_rag, ref_rag)

    print("KERNEL_OK")
</pallas_src>

<mosaic_0001>
module attributes {stable_mosaic.version = 11 : i64} {
  func.func @_loss_kernel(%arg0: i32, %arg1: i32, %arg2: memref<16x128xf32, #tpu.memory_space<vmem>>, %arg3: memref<16x128xf32, #tpu.memory_space<vmem>>, %arg4: memref<1x1xf32, #tpu.memory_space<smem>>, %arg5: memref<8x128xf32, #tpu.memory_space<vmem>>) attributes {dimension_semantics = [#tpu.dimension_semantics<arbitrary>, #tpu.dimension_semantics<arbitrary>], iteration_bounds = array<i64: 1, 1>, scalar_prefetch = 0 : i64, scratch_operands = 1 : i64, tpu.core_type = #tpu.core_type<tc>, window_params = [{transform_indices = @transform_0, window_bounds = array<i64: 16, 128>}, {transform_indices = @transform_1, window_bounds = array<i64: 16, 128>}, {transform_indices = @transform_2, window_bounds = array<i64: 1, 1>}]} {
    %c0_i32 = arith.constant 0 : i32
    %0 = arith.cmpi eq, %arg1, %c0_i32 : i32
    %1 = arith.extui %0 : i1 to i32
    %c0_i32_0 = arith.constant 0 : i32
    %2 = arith.cmpi ne, %1, %c0_i32_0 : i32
    scf.if %2 {
      %cst_13 = arith.constant 0.000000e+00 : f32
      %36 = vector.broadcast %cst_13 : f32 to vector<8x128xf32>
      %c0_14 = arith.constant 0 : index
      %c0_15 = arith.constant 0 : index
      %37 = vector.load %arg5[%c0_14, %c0_15] : memref<8x128xf32, #tpu.memory_space<vmem>>, vector<8x128xf32>
      tpu.vector_store %arg5[%c0_14, %c0_15], %36 {strides = array<i32>} : memref<8x128xf32, #tpu.memory_space<vmem>>, vector<8x128xf32>,
    } else {
    }
    %c0 = arith.constant 0 : index
    %c0_1 = arith.constant 0 : index
    %3 = vector.load %arg5[%c0, %c0_1] : memref<8x128xf32, #tpu.memory_space<vmem>>, vector<8x128xf32>
    %cst = arith.constant 0.000000e+00 : f32
    %4 = vector.broadcast %cst : f32 to vector<8x128xf32>
    %cst_2 = arith.constant 1.000000e-01 : f32
    %c0_i32_3 = arith.constant 0 : i32
    %c8_i32 = arith.constant 8 : i32
    %5 = arith.muli %c0_i32_3, %c8_i32 : i32
    %6 = tpu.assume_multiple %5, 8 : i32
    %7 = arith.index_cast %6 : i32 to index
    %c0_4 = arith.constant 0 : index
    %8 = vector.load %arg2[%7, %c0_4] : memref<16x128xf32, #tpu.memory_space<vmem>>, vector<8x128xf32>
    %9 = arith.index_cast %6 : i32 to index
    %c0_5 = arith.constant 0 : index
    %10 = vector.load %arg3[%9, %c0_5] : memref<16x128xf32, #tpu.memory_space<vmem>>, vector<8x128xf32>
    %11 = arith.subf %8, %10 : vector<8x128xf32>
    %12 = arith.mulf %11, %11 : vector<8x128xf32>
    %13 = math.absf %11 : vector<8x128xf32>
    %14 = vector.broadcast %cst_2 : f32 to vector<8x128xf32>
    %15 = arith.mulf %14, %13 : vector<8x128xf32>
    %16 = arith.addf %12, %15 : vector<8x128xf32>
    %17 = arith.addf %4, %16 : vector<8x128xf32>
    %c1_i32 = arith.constant 1 : i32
    %c8_i32_6 = arith.constant 8 : i32
    %18 = arith.muli %c1_i32, %c8_i32_6 : i32
    %19 = tpu.assume_multiple %18, 8 : i32
    %20 = arith.index_cast %19 : i32 to index
    %c0_7 = arith.constant 0 : index
    %21 = vector.load %arg2[%20, %c0_7] : memref<16x128xf32, #tpu.memory_space<vmem>>, vector<8x128xf32>
    %22 = arith.index_cast %19 : i32 to index
    %c0_8 = arith.constant 0 : index
    %23 = vector.load %arg3[%22, %c0_8] : memref<16x128xf32, #tpu.memory_space<vmem>>, vector<8x128xf32>
    %24 = arith.subf %21, %23 : vector<8x128xf32>
    %25 = arith.mulf %24, %24 : vector<8x128xf32>
    %26 = math.absf %24 : vector<8x128xf32>
    %27 = vector.broadcast %cst_2 : f32 to vector<8x128xf32>
    %28 = arith.mulf %27, %26 : vector<8x128xf32>
    %29 = arith.addf %25, %28 : vector<8x128xf32>
    %30 = arith.addf %17, %29 : vector<8x128xf32>
    %c2_i32 = arith.constant 2 : i32
    %31 = arith.addf %3, %30 : vector<8x128xf32>
    %c0_9 = arith.constant 0 : index
    %c0_10 = arith.constant 0 : index
    %32 = vector.load %arg5[%c0_9, %c0_10] : memref<8x128xf32, #tpu.memory_space<vmem>>, vector<8x128xf32>
    tpu.vector_store %arg5[%c0_9, %c0_10], %31 {strides = array<i32>} : memref<8x128xf32, #tpu.memory_space<vmem>>, vector<8x128xf32>,
    %c0_i32_11 = arith.constant 0 : i32
    %33 = arith.cmpi eq, %arg1, %c0_i32_11 : i32
    %34 = arith.extui %33 : i1 to i32
    %c0_i32_12 = arith.constant 0 : i32
    %35 = arith.cmpi ne, %34, %c0_i32_12 : i32
    scf.if %35 {
      %c0_13 = arith.constant 0 : index
      %c0_14 = arith.constant 0 : index
      %36 = vector.load %arg5[%c0_13, %c0_14] : memref<8x128xf32, #tpu.memory_space<vmem>>, vector<8x128xf32>
      %37 = vector.shape_cast %36 : vector<8x128xf32> to vector<1x8x128xf32>
      %cst_15 = arith.constant dense<0.000000e+00> : vector<1xf32>
      %38 = vector.multi_reduction <add>, %37, %cst_15 [1, 2] : vector<1x8x128xf32> to vector<1xf32>
      %39 = vector.shape_cast %38 : vector<1xf32> to vector<1x1x1xf32>
      %40 = vector.extract %39[0, 0, 0] : f32 from vector<1x1x1xf32>
      %c0_16 = arith.constant 0 : index
      %c0_17 = arith.constant 0 : index
      %41 = memref.load %arg4[%c0_16, %c0_17] : memref<1x1xf32, #tpu.memory_space<smem>>
      memref.store %40, %arg4[%c0_16, %c0_17] : memref<1x1xf32, #tpu.memory_space<smem>>
    } else {
    }
    return
  }
  func.func @transform_0(%arg0: i32, %arg1: i32) -> (i32, i32) {
    %c1_i32 = arith.constant 1 : i32
    %0 = arith.muli %arg0, %c1_i32 : i32
    %1 = arith.addi %0, %arg1 : i32
    %c0_i32 = arith.constant 0 : i32
    %c0_i32_0 = arith.constant 0 : i32
    return %1, %c0_i32 : i32, i32
  }
  func.func @transform_1(%arg0: i32, %arg1: i32) -> (i32, i32) {
    %c1_i32 = arith.constant 1 : i32
    %0 = arith.muli %arg0, %c1_i32 : i32
    %1 = arith.addi %0, %arg1 : i32
    %c0_i32 = arith.constant 0 : i32
    %c0_i32_0 = arith.constant 0 : i32
    return %1, %c0_i32 : i32, i32
  }
  func.func @transform_2(%arg0: i32, %arg1: i32) -> (i32, i32) {
    %c0_i32 = arith.constant 0 : i32
    %c0_i32_0 = arith.constant 0 : i32
    return %arg0, %c0_i32 : i32, i32
  }
}

</mosaic_0001>

<bundles_post_ra>
// kernel: head_detection_loss.1
= control target key start
LH: loop header
LB: loop body
LE: loop exit
PB: predicated region body
PF: predicated region fallthrough
CT: control target
= control target key end

     0   :  { %s179_s0 = inlined_call_operand.vmem [shape: f32[16,128], index: 0, kind: input, shape index: {}]   ;;  %s180_s1 = inlined_call_operand.vmem [shape: f32[16,128], index: 1, kind: input, shape index: {}]   ;;  %s181_s2 = inlined_call_operand.hbm [shape: f32[1,1], index: 2, kind: output, shape index: {}]  }
   0x1   :  { %v62_v0 = vld [vmem:[%s179_s0] sm:$0xff]  ;;  %v122_v2 = vld [vmem:[%s179_s0 + $0x8] sm:$0xff] }
   0x2   :  { %v63_v1 = vld [vmem:[%s180_s1] sm:$0xff]  ;;  %v123_v4 = vld [vmem:[%s180_s1 + $0x8] sm:$0xff] }
   0x3   :  { %v64_v3 = vsub.f32 %v62_v0, %v63_v1 }
   0x4   :  { %7 = vsyncpa [#allocation4], 0  ;;  %v74_v5 = vsub.f32 %v122_v2, %v123_v4  ;;  %s127_s18 = scalar_lea.hbm %s181_s2, 16 }
   0x5   :  { %v65_v6 = vmul.f32 %v64_v3, %v64_v3  ;;  %v66_v7 = vand.u32 2147483647, %v64_v3  ;;  %p128_p0 = scmp.ne.s32.totalorder %s181_s2, %s127_s18  ;;  %p131_p1 = scmp.lt.u32.totalorder %s127_s18, %s181_s2 }
   0x6   :  { %v75_v8 = vmul.f32 %v74_v5, %v74_v5  ;;  %v76_v9 = vand.u32 2147483647, %v74_v5 }
   0x7   :  { %v67_v10 = vmul.f32 0.1, %v66_v7  ;;  %p133_p2 = pnand %p131_p1, %p128_p0 }
   0x8   :  { %v77_v11 = vmul.f32 0.1, %v76_v9 }
   0x9   :  { %v68_v12 = vadd.f32 %v67_v10, %v65_v6 }
   0xa   :  { %v78_v13 = vadd.f32 %v77_v11, %v75_v8 }
   0xc   :  { %v79_v14 = vadd.f32 %v78_v13, %v68_v12 }
   0xe   :  { %86 = vadd.xlane.f32.xlu0 %v79_v14 }
  0x9b   :  { %v87_v15 = vpop.xlane.xlu0 %86 }
  0x9c   :  { %v88_v16 = vrot.slane %v87_v15, 4 }
  0x9e   :  { %v89_v17 = vadd.f32 %v88_v16, %v87_v15 }
  0xa0   :  { %v90_v18 = vrot.slane %v89_v17, 2 }
  0xa2   :  { %v91_v19 = vadd.f32 %v90_v18, %v89_v17 }
  0xa4   :  { %v92_v20 = vrot.slane %v91_v19, 1 }
  0xa6   :  { %v93_v21 = vadd.f32 %v92_v20, %v91_v19 }
  0xa8   :  { %124 = vpush %v93_v21 }
  0xd9   :  { %s125_s0 = spop %124 }
  0xda   :  { %96 = sst [smem:[#allocation3]] %s125_s0 }
  0xdb   :  { %136 = shalt.err (!%p133_p2)
}
  0xdc   :  { %s139_s23 = smov [#allocation3]  }
  0xdd   :  { %104 = dma.smem_to_hbm %s139_s23, 16, %s181_s2, [#allocation4]  }
  0xde   :  { %137 = dma.done.wait [#allocation4], 16  }
  0xdf   :  { %138 = vsyncadd [#allocation4], 4294967280 }
  0xe0   :  { %108 = sfence }
  0xe1   :  { %109 = vsyncpa [#allocation4], 1 }

</bundles_post_ra>
